<compile_context>
chip_gen: v5e
topology: v5e:2x2
jax: 0.10.0
libtpu: 0.0.40
codegen_flags: <defaults>
</compile_context>

<pallas_src>
import jax
import jax.numpy as jnp
from jax.experimental import pallas as pl
from jax.experimental.pallas import tpu as pltpu


def _round_up(v: int, m: int) -> int:
    return ((v + m - 1) // m) * m


def _chip_config():
    """Per-generation VMEM budgets; falls back to v7x-safe numbers."""
    try:
        info = pltpu.get_tpu_info()
        vmem_bytes = int(getattr(info, "vmem_capacity_bytes"))
    except Exception:
        vmem_bytes = 64 * 1024 * 1024            # assume the smallest (v7x-like)
    if vmem_bytes <= 0:
        vmem_bytes = 64 * 1024 * 1024
    if vmem_bytes >= 100 * 1024 * 1024:
        # v5e / v6e: 128 MiB VMEM, single TensorCore -> big tiles, no forced split.
        return {"x_buf_budget": 28 * 1024 * 1024,
                "vmem_limit": 80 * 1024 * 1024,
                "multi_core": False}
    # v7x (64 MiB VMEM per TensorCore, 2 TensorCores) or unknown.
    return {"x_buf_budget": 12 * 1024 * 1024,
            "vmem_limit": 48 * 1024 * 1024,
            "multi_core": True}


def _pick_tm_rows(n_rows: int, row_bytes: int, cfg) -> int:
    """Rows (of the 2-D layout handed to the kernel) per grid step."""
    tm = max(8, (cfg["x_buf_budget"] // max(row_bytes, 1)) // 8 * 8)
    if tm >= n_rows:
        # Whole problem fits in one tile.  On 2-TensorCore chips (v7x), split
        # into two "parallel" steps only when there is enough data to be
        # worth sharding across the cores (per-step overhead ~0.35 us).
        if (cfg["multi_core"] and n_rows >= 16
                and n_rows * row_bytes >= 4 * 1024 * 1024):
            tm = max(8, _round_up(pl.cdiv(n_rows, 2), 8))
        else:
            tm = n_rows
    return tm


def _linreg_kernel(b_ref, w_ref, x_ref, o_ref):
    # Natural MXU orientation: the big x tile is the streamed LHS, contracted
    # on its last (lane) dim against the small stationary weight block, so no
    # transpose of the large operand is ever emitted (XLU stays idle).
    acc = jnp.dot(x_ref[...], w_ref[...], preferred_element_type=jnp.float32)
    o_ref[...] = (acc + b_ref[0]).astype(o_ref.dtype)


def _matmul_bias_rows(x2d, w2d, b, *, tm, cfg, out_dtype):
    """out = (x2d @ w2d + b), tiled over rows of x2d with a 1-D parallel grid."""
    R, C = x2d.shape
    Cw, P = w2d.shape
    assert Cw == C

    tm = min(int(tm), R)
    if tm < R:
        tm = max(8, (tm // 8) * 8)
        if tm >= R:
            tm = R
    grid0 = pl.cdiv(R, tm)
    r_pad = grid0 * tm   # ragged last x block reads garbage rows (safe with
                         # auto BlockSpec); padded output rows are sliced off.

    itemsize = x2d.dtype.itemsize
    out_itemsize = jnp.dtype(out_dtype).itemsize
    cost = pl.CostEstimate(
        flops=2 * R * C * P,
        transcendentals=0,
        bytes_accessed=(R * C * itemsize
                        + C * P * w2d.dtype.itemsize
                        + r_pad * P * out_itemsize),
    )

    out = pl.pallas_call(
        _linreg_kernel,
        out_shape=jax.ShapeDtypeStruct((r_pad, P), out_dtype),
        grid_spec=pltpu.PrefetchScalarGridSpec(
            num_scalar_prefetch=0,
            grid=(grid0,),
            in_specs=[
                # bias: tiny scalar, lives in SMEM
                pl.BlockSpec((1,), lambda i: (0,), memory_space=pltpu.SMEM),
                # weight block: small, grid-invariant (resident in VMEM)
                pl.BlockSpec((C, P), lambda i: (0, 0)),
                # x: large row tiles, full feature dim on lanes
                pl.BlockSpec((tm, C), lambda i: (i, 0)),
            ],
            out_specs=pl.BlockSpec((tm, P), lambda i: (i, 0)),
        ),
        compiler_params=pltpu.CompilerParams(
            dimension_semantics=("parallel",),
            vmem_limit_bytes=cfg["vmem_limit"],
        ),
        cost_estimate=cost,
    )(b, w2d, x2d)
    return out[:R]


def linear_regression_forward(x, w, b, *, tile_rows=None):
    """y = x @ w + b (LinearRegressionModel.forward) computed in Pallas.

    x: (n, ndims), w: (ndims, 1), b: (1,).  Returns float32 (n, 1).
    Callers may feed bf16 x for ~2x HBM bandwidth; weights are then downcast
    to bf16 for the MXU while accumulation / bias / output stay float32.
    `tile_rows` is a test/tuning override (rows of the 2-D layout handed to
    the kernel); by default tiles are sized from the per-chip VMEM budget.
    """
    n, ndims = x.shape
    assert w.shape == (ndims, 1)
    assert b.shape == (1,)
    out_dtype = jnp.float32
    cfg = _chip_config()
    b32 = b.astype(jnp.float32)

    r = 128 // ndims if (0 < ndims <= 128 and 128 % ndims == 0) else 1
    if r > 1 and n > 0 and n % r == 0:
        # Folded fast path: (n, ndims) -> (n/r, 128) (zero-copy for row-major
        # x); weights block-stacked into a (128, r) block-diagonal matrix so
        # output column k is the dot of lane group k with w.  (Padded weight
        # lanes are exact zeros; assumes finite activations.)
        n_f = n // r
        x_f = x.reshape(n_f, 128)
        w_f = jnp.kron(jnp.eye(r, dtype=jnp.float32),
                       w.astype(jnp.float32)).astype(x.dtype)      # (128, r)
        tm = tile_rows if tile_rows is not None else _pick_tm_rows(
            n_f, 128 * x.dtype.itemsize, cfg)
        out = _matmul_bias_rows(x_f, w_f, b32, tm=tm, cfg=cfg, out_dtype=out_dtype)
        return out.reshape(n, 1)

    # General path (ndims does not divide 128, or ragged n): natural
    # (tm, ndims) @ (ndims, 1) tiles.  Lane dim pads ndims -> multiple of 128
    # in VMEM, so this is less DMA-efficient than the folded path but still
    # transpose-free and correct for any shape.  (A K grid axis + f32
    # accumulator would only be needed for ndims >> 8k — not this model.)
    w_c = w.astype(x.dtype)
    row_bytes = _round_up(max(ndims, 1), 128) * x.dtype.itemsize
    tm = tile_rows if tile_rows is not None else _pick_tm_rows(n, row_bytes, cfg)
    return _matmul_bias_rows(x, w_c, b32, tm=tm, cfg=cfg, out_dtype=out_dtype)


if __name__ == "__main__":
    key = jax.random.PRNGKey(0)
    kx, kw, kb, kx2, kx3 = jax.random.split(key, 5)

    # Small shapes consistent with the module: batch N=8, ndims=32.
    N, NDIMS = 8, 32
    x = jax.random.normal(kx, (N, NDIMS), dtype=jnp.float32)
    w = jax.random.normal(kw, (NDIMS, 1), dtype=jnp.float32)   # ~ torch.randn(ndims, 1)
    b = jax.random.normal(kb, (1,), dtype=jnp.float32)         # ~ torch.randn(1)

    y = jax.block_until_ready(linear_regression_forward(x, w, b))
    y_ref = x @ w + b
    assert y.shape == (N, 1)
    assert jnp.allclose(y, y_ref, rtol=1e-5, atol=1e-4)

    # Folded path with a multi-step grid + ragged last block (n_f=250, tm=64).
    N2 = 1000
    x2 = jax.random.normal(kx2, (N2, NDIMS), dtype=jnp.float32)
    y2 = jax.block_until_ready(linear_regression_forward(x2, w, b, tile_rows=64))
    y2_ref = x2 @ w + b
    assert y2.shape == (N2, 1)
    assert jnp.allclose(y2, y2_ref, rtol=1e-5, atol=1e-4)

    # General (unfolded) path: n not a multiple of 128//ndims, tiled + ragged.
    N3 = 1001
    x3 = jax.random.normal(kx3, (N3, NDIMS), dtype=jnp.float32)
    y3 = jax.block_until_ready(linear_regression_forward(x3, w, b, tile_rows=256))
    y3_ref = x3 @ w + b
    assert y3.shape == (N3, 1)
    assert jnp.allclose(y3, y3_ref, rtol=1e-5, atol=1e-4)

    print("KERNEL_OK")
</pallas_src>

<mosaic_0001>
module attributes {stable_mosaic.version = 11 : i64} {
  func.func @_linreg_kernel(%arg0: i32, %arg1: memref<1xf32, #tpu.memory_space<smem>>, %arg2: memref<128x4xf32, #tpu.memory_space<vmem>>, %arg3: memref<2x128xf32, #tpu.memory_space<vmem>>, %arg4: memref<2x4xf32, #tpu.memory_space<vmem>>) attributes {dimension_semantics = [#tpu.dimension_semantics<parallel>], iteration_bounds = array<i64: 1>, scalar_prefetch = 0 : i64, scratch_operands = 0 : i64, tpu.core_type = #tpu.core_type<tc>, window_params = [{transform_indices = @transform_0, window_bounds = array<i64: 1>}, {pipeline_mode = #tpu.pipeline_mode<synchronous>, transform_indices = @transform_1, window_bounds = array<i64: 128, 4>}, {transform_indices = @transform_2, window_bounds = array<i64: 2, 128>}, {transform_indices = @transform_3, window_bounds = array<i64: 2, 4>}]} {
    %c0 = arith.constant 0 : index
    %c0_0 = arith.constant 0 : index
    %0 = vector.load %arg3[%c0, %c0_0] : memref<2x128xf32, #tpu.memory_space<vmem>>, vector<2x128xf32>
    %c0_1 = arith.constant 0 : index
    %c0_2 = arith.constant 0 : index
    %1 = vector.load %arg2[%c0_1, %c0_2] : memref<128x4xf32, #tpu.memory_space<vmem>>, vector<128x4xf32>
    %cst = arith.constant dense<0.000000e+00> : vector<2x4xf32>
    %2 = tpu.matmul %0, %1, %cst {dimension_numbers = #tpu.dot_dimension_numbers<[1], [0], [0], [1], [0, 0, 1, 1], [], []>} : vector<2x128xf32>, vector<128x4xf32>, vector<2x4xf32> -> vector<2x4xf32>
    %c0_3 = arith.constant 0 : index
    %3 = memref.load %arg1[%c0_3] : memref<1xf32, #tpu.memory_space<smem>>
    %4 = vector.broadcast %3 : f32 to vector<2x4xf32>
    %5 = arith.addf %2, %4 : vector<2x4xf32>
    %c0_4 = arith.constant 0 : index
    %c0_5 = arith.constant 0 : index
    %6 = vector.load %arg4[%c0_4, %c0_5] : memref<2x4xf32, #tpu.memory_space<vmem>>, vector<2x4xf32>
    tpu.vector_store %arg4[%c0_4, %c0_5], %5 {strides = array<i32>} : memref<2x4xf32, #tpu.memory_space<vmem>>, vector<2x4xf32>,
    return
  }
  func.func @transform_0(%arg0: i32) -> i32 {
    %c0_i32 = arith.constant 0 : i32
    %c0_i32_0 = arith.constant 0 : i32
    return %c0_i32 : i32
  }
  func.func @transform_1(%arg0: i32) -> (i32, i32) {
    %c0_i32 = arith.constant 0 : i32
    %c0_i32_0 = arith.constant 0 : i32
    %c0_i32_1 = arith.constant 0 : i32
    return %c0_i32, %c0_i32_0 : i32, i32
  }
  func.func @transform_2(%arg0: i32) -> (i32, i32) {
    %c0_i32 = arith.constant 0 : i32
    %c0_i32_0 = arith.constant 0 : i32
    return %arg0, %c0_i32 : i32, i32
  }
  func.func @transform_3(%arg0: i32) -> (i32, i32) {
    %c0_i32 = arith.constant 0 : i32
    %c0_i32_0 = arith.constant 0 : i32
    return %arg0, %c0_i32 : i32, i32
  }
}

</mosaic_0001>

<bundles_post_ra>
// kernel: tpu_custom_call.1
= control target key start
LH: loop header
LB: loop body
LE: loop exit
PB: predicated region body
PF: predicated region fallthrough
CT: control target
= control target key end

     0   :  { %s178_s0 = inlined_call_operand.<no memory space> [shape: f32[1], index: 0, kind: input, shape index: {}]   ;;  %s179_s1 = inlined_call_operand.vmem [shape: f32[128,4], index: 1, kind: input, shape index: {}]   ;;  %s180_s2 = inlined_call_operand.vmem [shape: f32[2,128], index: 2, kind: input, shape index: {}]   ;;  %s181_s3 = inlined_call_operand.hbm [shape: f32[2,4], index: 3, kind: output, shape index: {}]  }
   0x1   :  { %v32_v0 = vld [vmem:[%s179_s1 + $0x78] sm:$0xff]  ;;  %v31_v1 = vld [vmem:[%s179_s1 + $0x70] sm:$0xff]  ;;  %v30_v2 = vld [vmem:[%s179_s1 + $0x68] sm:$0xff] }
   0x2   :  { %35 = vmatpush.msra.mxu0 %v32_v0  ;;  %v29_v3 = vld [vmem:[%s179_s1 + $0x60] sm:$0xff] }
   0x4   :  { %36 = vmatpush.msra.mxu0 %v31_v1 }
   0x6   :  { %37 = vmatpush.msra.mxu0 %v30_v2 }
   0x7   :  { %9 = vsyncpa [#allocation4], 0  ;;  %v28_v4 = vld [vmem:[%s179_s1 + $0x58] sm:$0xff]  ;;  %v27_v5 = vld [vmem:[%s179_s1 + $0x50] sm:$0xff]  ;;  %v34_v17 = vstv %s178_s0  ;;  %s100_s21 = smov [#allocation3]   ;;  %s64_s25 = sshll.u32 %s181_s3, 4  ;;  %s65_s25 = int_to_ptr.hbm [resolvable:$true] %s64_s25 }
   0x8   :  { %38 = vmatpush.msra.mxu0 %v29_v3  ;;  %v26_v6 = vld [vmem:[%s179_s1 + $0x48] sm:$0xff]  ;;  %v25_v7 = vld [vmem:[%s179_s1 + $0x40] sm:$0xff]  ;;  %v24_v8 = vld [vmem:[%s179_s1 + $0x38] sm:$0xff]  ;;  %s62_s22 = sshll.u32 %s100_s21, 4  ;;  %vm55_vm0 = vcmask 25600   ;;  %s63_s22 = int_to_ptr.vmem [resolvable:$true] %s62_s22 }
   0x9   :  { %v23_v9 = vld [vmem:[%s179_s1 + $0x30] sm:$0xff]  ;;  %v22_v10 = vld [vmem:[%s179_s1 + $0x28] sm:$0xff]  ;;  %v21_v11 = vld [vmem:[%s179_s1 + $0x20] sm:$0xff] }
   0xa   :  { %39 = vmatpush.msra.mxu0 %v28_v4  ;;  %v20_v12 = vld [vmem:[%s179_s1 + $0x18] sm:$0xff]  ;;  %v19_v13 = vld [vmem:[%s179_s1 + $0x10] sm:$0xff]  ;;  %v18_v14 = vld [vmem:[%s179_s1 + $0x8] sm:$0xff] }
   0xb   :  { %v17_v15 = vld [vmem:[%s179_s1] sm:$0xff] }
   0xc   :  { %40 = vmatpush.msra.mxu0 %v27_v5  ;;  %v16_v16 = vld [vmem:[%s180_s2] sm:$0x3] }
   0xe   :  { %41 = vmatpush.msra.mxu0 %v26_v6 }
  0x10   :  { %42 = vmatpush.msra.mxu0 %v25_v7 }
  0x12   :  { %43 = vmatpush.msra.mxu0 %v24_v8 }
  0x14   :  { %44 = vmatpush.msra.mxu0 %v23_v9 }
  0x16   :  { %45 = vmatpush.msra.mxu0 %v22_v10 }
  0x18   :  { %46 = vmatpush.msra.mxu0 %v21_v11 }
  0x1a   :  { %47 = vmatpush.msra.mxu0 %v20_v12 }
  0x1c   :  { %48 = vmatpush.msra.mxu0 %v19_v13 }
  0x1e   :  { %49 = vmatpush.msra.mxu0 %v18_v14 }
  0x20   :  { %50 = vmatpush.msra.mxu0 %v17_v15 }
  0x21   :  { %51 = vmatmul.f32.vlgmr.msra.gmra.mxu0 %v16_v16 }
  0x9e   :  { %v52_v18 = vpop.f32.mrf.mxu0 }
  0x9f   :  { %v53_v19 = vadd.f32 %v52_v18, %v34_v17 }
  0xa1   :  { %56 = vst.msk [vmem:[#allocation3] sm:$0x3] %vm55_vm0, %v53_v19 }
  0xa2   :  { %67 = dma.vmem_to_hbm [thread:$0]  %s63_s22, 32, %s65_s25, [#allocation4]  }
  0xa3   :  { %98 = dma.done.wait [#allocation4], 32  }
  0xa4   :  { %99 = vsyncadd [#allocation4], 4294967264 }
  0xa5   :  { %72 = vsyncpa [#allocation4], 1 }

</bundles_post_ra>
